<compile_context>
chip_gen: v6e
topology: v6e:2x2x1
jax: 0.10.0
libtpu: 0.0.40
codegen_flags: <defaults>
</compile_context>

<pallas_src>
import functools

import jax
import jax.numpy as jnp
from jax.experimental import pallas as pl
from jax.experimental.pallas import tpu as pltpu


def _encoder_layer_kernel(x_ref, wq_ref, bq_ref, wk_ref, bk_ref, wv_ref, bv_ref,
                          w1_ref, b1_ref, w2_ref, b2_ref, o_ref,
                          *, n_heads, head_dim):
    block_b, S, D = x_ref.shape
    rows = block_b * S

    x3 = x_ref[...]                                    # (Bt, S, D) f32 (residual)
    x2 = x3.reshape(rows, D)                           # fold batch into M dim
    xb = x2.astype(jnp.bfloat16)

    # Q/K/V projections: one big bf16 matmul each (M = Bt*S), f32 accumulate.
    # The 1/sqrt(head_dim) scale is pre-folded into wq / bq at prep time.
    q = jnp.dot(xb, wq_ref[...], preferred_element_type=jnp.float32) + bq_ref[...]
    k = jnp.dot(xb, wk_ref[...], preferred_element_type=jnp.float32) + bk_ref[...]
    v = jnp.dot(xb, wv_ref[...], preferred_element_type=jnp.float32) + bv_ref[...]

    qb = q.reshape(block_b, S, D).astype(jnp.bfloat16)
    kb = k.reshape(block_b, S, D).astype(jnp.bfloat16)
    vb = v.reshape(block_b, S, D).astype(jnp.bfloat16)

    # Multi-head attention. Per-head 3-D einsums batched over the batch-block
    # (leading batch dim -> clean MXU lowering). Head outputs are kept in
    # registers and concatenated once -> one full-width residual add + store,
    # no VMEM scratch round-trip, no masked partial stores.
    heads = []
    for h in range(n_heads):
        lo = h * head_dim
        hi = lo + head_dim
        qh = qb[:, :, lo:hi]                           # (Bt, S, hd) bf16
        kh = kb[:, :, lo:hi]
        vh = vb[:, :, lo:hi]
        s = jnp.einsum("bqd,bkd->bqk", qh, kh,
                       preferred_element_type=jnp.float32)          # (Bt,S,S) f32
        m = jnp.max(s, axis=-1, keepdims=True)
        e = jnp.exp(s - m)                                          # f32
        inv = pl.reciprocal(jnp.sum(e, axis=-1, keepdims=True), approx=True)
        oh = jnp.einsum("bqk,bkd->bqd", e.astype(jnp.bfloat16), vh,
                        preferred_element_type=jnp.float32)         # (Bt,S,hd)
        # Deferred normalization: hd-wide multiply instead of S-wide; applied
        # before the residual add (matches exact softmax semantics).
        heads.append(oh * inv)

    attn = jnp.concatenate(heads, axis=-1)             # (Bt, S, D) f32
    y3 = attn + x3                                     # fused residual add
    yb = y3.reshape(rows, D).astype(jnp.bfloat16)

    # Feedforward: Linear -> LeakyReLU(0.01) -> Linear, again with M = Bt*S.
    h1 = jnp.dot(yb, w1_ref[...], preferred_element_type=jnp.float32) + b1_ref[...]
    h1 = jnp.where(h1 >= 0, h1, 0.01 * h1)
    out = jnp.dot(h1.astype(jnp.bfloat16), w2_ref[...],
                  preferred_element_type=jnp.float32) + b2_ref[...]

    o_ref[...] = out.reshape(block_b, S, D).astype(o_ref.dtype)


def _tpu_config():
    """Per-generation VMEM limit / block target. Falls back to conservative
    (64 MiB-class) numbers if hardware introspection is unavailable."""
    vmem_phys = 64 * 1024 * 1024
    try:
        info_fn = getattr(pltpu, "get_tpu_info", None)
        if info_fn is not None:
            info = info_fn()
            vmem_phys = int(getattr(info, "vmem_capacity_bytes", vmem_phys))
    except Exception:
        pass
    if vmem_phys <= 64 * 1024 * 1024:
        # v7x-like: 64 MiB per TensorCore, 2 TCs/chip -> keep >=2 grid steps
        # so dimension_semantics=("parallel",) can shard across cores, and
        # leave headroom below physical VMEM.
        return dict(vmem_limit=48 * 1024 * 1024, target_rows=256, two_cores=True)
    # v5e / v6e: 128 MiB VMEM, single TensorCore -> bigger blocks, no forced
    # grid split (it would only add grid-step overhead).
    return dict(vmem_limit=100 * 1024 * 1024, target_rows=512, two_cores=False)


def _pick_block_b(B, S, D, d_ff, n_heads, cfg):
    """Largest divisor of B whose token count (block_b*S) fits the per-step
    VMEM budget and the generation's row target; on 2-TC parts keep >= 2 grid
    steps when B >= 2 so both cores get work."""
    # Rough f32 live bytes per token: x,q,k,v,attn,y,out (+bf16 copies) + per
    # head S scores + d_ff hidden, plus double-buffered in/out blocks.
    bytes_per_token = 4 * (10 * D + n_heads * S + 2 * d_ff)
    weight_bytes = 2 * 2 * (3 * D * D + 2 * D * d_ff)      # bf16, double-buffered
    budget = max(cfg["vmem_limit"] // 2 - weight_bytes, S * bytes_per_token)
    cap_tokens = max(min(cfg["target_rows"], budget // bytes_per_token), S)

    best = 1
    for d in range(1, B + 1):
        if B % d == 0 and d * S <= cap_tokens:
            best = d
    if cfg["two_cores"] and B >= 2 and B // best < 2:
        for d in range(best, 0, -1):
            if B % d == 0 and B // d >= 2:
                best = d
                break
    return best


def prepare_params(raw, n_heads):
    """One-time host-side parameter prep: fold 1/sqrt(head_dim) into wq/bq,
    cast weights to bf16 (MXU-peak operands, half the DMA bytes), keep biases
    in f32 (added after the f32 accumulation).  `raw` holds (in, out) weights
    and (1, out) biases in f32."""
    D = raw["wq"].shape[0]
    scale = 1.0 / ((D // n_heads) ** 0.5)
    p = {}
    for name in ("wq", "wk", "wv", "w1", "w2"):
        w = raw[name]
        if name == "wq":
            w = w * scale
        p[name] = w.astype(jnp.bfloat16)
    for name in ("bq", "bk", "bv", "b1", "b2"):
        b = raw[name]
        if name == "bq":
            b = b * scale
        p[name] = b.astype(jnp.float32)
    return p


def transformer_encoder_layer(x, params, *, n_heads, block_b=None):
    """x: (B, S, D) float32. params: prepare_params() output (bf16 weights)."""
    B, S, D = x.shape
    d_ff = params["w1"].shape[1]
    head_dim = D // n_heads
    assert head_dim * n_heads == D, "d_model must be divisible by n_heads"

    cfg = _tpu_config()
    if block_b is None:
        block_b = _pick_block_b(B, S, D, d_ff, n_heads, cfg)
    assert B % block_b == 0

    kernel = functools.partial(_encoder_layer_kernel,
                               n_heads=n_heads, head_dim=head_dim)

    def fixed(shape):
        # Whole-array operand, same block every grid step (weights/biases).
        return pl.BlockSpec(shape, lambda b: tuple(0 for _ in shape))

    flops = int(6 * B * S * D * D          # Q/K/V projections
                + 4 * B * S * S * D        # QK^T and PV over all heads
                + 4 * B * S * D * d_ff)    # two FFN matmuls
    transcendentals = int(B * n_heads * S * S + B * n_heads * S)
    bytes_accessed = int(2 * B * S * D * 4                  # x in + out
                         + (3 * D * D + 2 * D * d_ff) * 2   # bf16 weights
                         + (4 * D + d_ff) * 4)              # f32 biases

    return pl.pallas_call(
        kernel,
        out_shape=jax.ShapeDtypeStruct((B, S, D), x.dtype),
        grid_spec=pltpu.PrefetchScalarGridSpec(
            num_scalar_prefetch=0,
            grid=(B // block_b,),
            in_specs=[
                pl.BlockSpec((block_b, S, D), lambda b: (b, 0, 0)),   # x
                fixed((D, D)), fixed((1, D)),                         # Wq, bq
                fixed((D, D)), fixed((1, D)),                         # Wk, bk
                fixed((D, D)), fixed((1, D)),                         # Wv, bv
                fixed((D, d_ff)), fixed((1, d_ff)),                   # W1, b1
                fixed((d_ff, D)), fixed((1, D)),                      # W2, b2
            ],
            out_specs=pl.BlockSpec((block_b, S, D), lambda b: (b, 0, 0)),
        ),
        compiler_params=pltpu.CompilerParams(
            dimension_semantics=("parallel",),
            vmem_limit_bytes=cfg["vmem_limit"],
        ),
        cost_estimate=pl.CostEstimate(
            flops=flops,
            transcendentals=transcendentals,
            bytes_accessed=bytes_accessed,
        ),
    )(x,
      params["wq"], params["bq"],
      params["wk"], params["bk"],
      params["wv"], params["bv"],
      params["w1"], params["b1"],
      params["w2"], params["b2"])


def _reference(x, raw, n_heads):
    """Pure-JAX reference replicating the PyTorch forward exactly (f32 params)."""
    B, S, D = x.shape
    hd = D // n_heads
    q = x @ raw["wq"] + raw["bq"]
    k = x @ raw["wk"] + raw["bk"]
    v = x @ raw["wv"] + raw["bv"]

    def split(t):
        return t.reshape(B, S, n_heads, hd).transpose(0, 2, 1, 3)

    q, k, v = split(q), split(k), split(v)
    scores = jnp.einsum("bhqd,bhkd->bhqk", q, k) / (hd ** 0.5)
    probs = jax.nn.softmax(scores, axis=-1)
    attn = jnp.einsum("bhqk,bhkd->bhqd", probs, v)
    attn = attn.transpose(0, 2, 1, 3).reshape(B, S, D)
    y = attn + x
    h1 = y @ raw["w1"] + raw["b1"]
    h1 = jnp.where(h1 >= 0, h1, 0.01 * h1)
    return h1 @ raw["w2"] + raw["b2"]


if __name__ == "__main__":
    # Small shapes consistent with the module.
    B, S, D, n_heads, d_ff = 2, 8, 32, 4, 64

    key = jax.random.PRNGKey(0)
    ks = jax.random.split(key, 11)
    w_scale = 0.1

    # Weights stored already transposed to (in, out) so forward is x @ W + b.
    raw = {
        "wq": w_scale * jax.random.normal(ks[0], (D, D), jnp.float32),
        "bq": w_scale * jax.random.normal(ks[1], (1, D), jnp.float32),
        "wk": w_scale * jax.random.normal(ks[2], (D, D), jnp.float32),
        "bk": w_scale * jax.random.normal(ks[3], (1, D), jnp.float32),
        "wv": w_scale * jax.random.normal(ks[4], (D, D), jnp.float32),
        "bv": w_scale * jax.random.normal(ks[5], (1, D), jnp.float32),
        "w1": w_scale * jax.random.normal(ks[6], (D, d_ff), jnp.float32),
        "b1": w_scale * jax.random.normal(ks[7], (1, d_ff), jnp.float32),
        "w2": w_scale * jax.random.normal(ks[8], (d_ff, D), jnp.float32),
        "b2": w_scale * jax.random.normal(ks[9], (1, D), jnp.float32),
    }
    x = jax.random.normal(ks[10], (B, S, D), jnp.float32)

    params = prepare_params(raw, n_heads)
    out = transformer_encoder_layer(x, params, n_heads=n_heads)
    out = jax.block_until_ready(out)

    ref = _reference(x, raw, n_heads)
    assert out.shape == (B, S, D)
    # bf16 matmul operands + approx reciprocal in softmax -> looser tolerance.
    assert jnp.allclose(out, ref, atol=3e-2, rtol=3e-2), "mismatch vs reference"
    print("KERNEL_OK")
</pallas_src>

<mosaic_0001>
module attributes {stable_mosaic.version = 11 : i64} {
  func.func @_encoder_layer_kernel(%arg0: i32, %arg1: memref<1x8x32xf32, #tpu.memory_space<vmem>>, %arg2: memref<32x32xbf16, #tpu.memory_space<vmem>>, %arg3: memref<1x32xf32, #tpu.memory_space<vmem>>, %arg4: memref<32x32xbf16, #tpu.memory_space<vmem>>, %arg5: memref<1x32xf32, #tpu.memory_space<vmem>>, %arg6: memref<32x32xbf16, #tpu.memory_space<vmem>>, %arg7: memref<1x32xf32, #tpu.memory_space<vmem>>, %arg8: memref<32x64xbf16, #tpu.memory_space<vmem>>, %arg9: memref<1x64xf32, #tpu.memory_space<vmem>>, %arg10: memref<64x32xbf16, #tpu.memory_space<vmem>>, %arg11: memref<1x32xf32, #tpu.memory_space<vmem>>, %arg12: memref<1x8x32xf32, #tpu.memory_space<vmem>>) attributes {dimension_semantics = [#tpu.dimension_semantics<parallel>], iteration_bounds = array<i64: 2>, scalar_prefetch = 0 : i64, scratch_operands = 0 : i64, tpu.core_type = #tpu.core_type<tc>, window_params = [{transform_indices = @transform_0, window_bounds = array<i64: 1, 8, 32>}, {pipeline_mode = #tpu.pipeline_mode<synchronous>, transform_indices = @transform_1, window_bounds = array<i64: 32, 32>}, {pipeline_mode = #tpu.pipeline_mode<synchronous>, transform_indices = @transform_2, window_bounds = array<i64: 1, 32>}, {pipeline_mode = #tpu.pipeline_mode<synchronous>, transform_indices = @transform_3, window_bounds = array<i64: 32, 32>}, {pipeline_mode = #tpu.pipeline_mode<synchronous>, transform_indices = @transform_4, window_bounds = array<i64: 1, 32>}, {pipeline_mode = #tpu.pipeline_mode<synchronous>, transform_indices = @transform_5, window_bounds = array<i64: 32, 32>}, {pipeline_mode = #tpu.pipeline_mode<synchronous>, transform_indices = @transform_6, window_bounds = array<i64: 1, 32>}, {pipeline_mode = #tpu.pipeline_mode<synchronous>, transform_indices = @transform_7, window_bounds = array<i64: 32, 64>}, {pipeline_mode = #tpu.pipeline_mode<synchronous>, transform_indices = @transform_8, window_bounds = array<i64: 1, 64>}, {pipeline_mode = #tpu.pipeline_mode<synchronous>, transform_indices = @transform_9, window_bounds = array<i64: 64, 32>}, {pipeline_mode = #tpu.pipeline_mode<synchronous>, transform_indices = @transform_10, window_bounds = array<i64: 1, 32>}, {transform_indices = @transform_11, window_bounds = array<i64: 1, 8, 32>}]} {
    %c0 = arith.constant 0 : index
    %c0_0 = arith.constant 0 : index
    %c0_1 = arith.constant 0 : index
    %0 = vector.load %arg1[%c0, %c0_0, %c0_1] : memref<1x8x32xf32, #tpu.memory_space<vmem>>, vector<1x8x32xf32>
    %1 = vector.shape_cast %0 : vector<1x8x32xf32> to vector<8x32xf32>
    %2 = arith.truncf %1 : vector<8x32xf32> to vector<8x32xbf16>
    %c0_2 = arith.constant 0 : index
    %c0_3 = arith.constant 0 : index
    %3 = vector.load %arg2[%c0_2, %c0_3] : memref<32x32xbf16, #tpu.memory_space<vmem>>, vector<32x32xbf16>
    %cst = arith.constant dense<0.000000e+00> : vector<8x32xf32>
    %4 = tpu.matmul %2, %3, %cst {dimension_numbers = #tpu.dot_dimension_numbers<[1], [0], [0], [1], [0, 0, 1, 1], [], []>} : vector<8x32xbf16>, vector<32x32xbf16>, vector<8x32xf32> -> vector<8x32xf32>
    %c0_4 = arith.constant 0 : index
    %c0_5 = arith.constant 0 : index
    %5 = vector.load %arg3[%c0_4, %c0_5] : memref<1x32xf32, #tpu.memory_space<vmem>>, vector<1x32xf32>
    %6 = vector.broadcast %5 : vector<1x32xf32> to vector<8x32xf32>
    %7 = arith.addf %4, %6 : vector<8x32xf32>
    %c0_6 = arith.constant 0 : index
    %c0_7 = arith.constant 0 : index
    %8 = vector.load %arg4[%c0_6, %c0_7] : memref<32x32xbf16, #tpu.memory_space<vmem>>, vector<32x32xbf16>
    %cst_8 = arith.constant dense<0.000000e+00> : vector<8x32xf32>
    %9 = tpu.matmul %2, %8, %cst_8 {dimension_numbers = #tpu.dot_dimension_numbers<[1], [0], [0], [1], [0, 0, 1, 1], [], []>} : vector<8x32xbf16>, vector<32x32xbf16>, vector<8x32xf32> -> vector<8x32xf32>
    %c0_9 = arith.constant 0 : index
    %c0_10 = arith.constant 0 : index
    %10 = vector.load %arg5[%c0_9, %c0_10] : memref<1x32xf32, #tpu.memory_space<vmem>>, vector<1x32xf32>
    %11 = vector.broadcast %10 : vector<1x32xf32> to vector<8x32xf32>
    %12 = arith.addf %9, %11 : vector<8x32xf32>
    %c0_11 = arith.constant 0 : index
    %c0_12 = arith.constant 0 : index
    %13 = vector.load %arg6[%c0_11, %c0_12] : memref<32x32xbf16, #tpu.memory_space<vmem>>, vector<32x32xbf16>
    %cst_13 = arith.constant dense<0.000000e+00> : vector<8x32xf32>
    %14 = tpu.matmul %2, %13, %cst_13 {dimension_numbers = #tpu.dot_dimension_numbers<[1], [0], [0], [1], [0, 0, 1, 1], [], []>} : vector<8x32xbf16>, vector<32x32xbf16>, vector<8x32xf32> -> vector<8x32xf32>
    %c0_14 = arith.constant 0 : index
    %c0_15 = arith.constant 0 : index
    %15 = vector.load %arg7[%c0_14, %c0_15] : memref<1x32xf32, #tpu.memory_space<vmem>>, vector<1x32xf32>
    %16 = vector.broadcast %15 : vector<1x32xf32> to vector<8x32xf32>
    %17 = arith.addf %14, %16 : vector<8x32xf32>
    %18 = vector.shape_cast %7 : vector<8x32xf32> to vector<1x8x32xf32>
    %19 = arith.truncf %18 : vector<1x8x32xf32> to vector<1x8x32xbf16>
    %20 = vector.shape_cast %12 : vector<8x32xf32> to vector<1x8x32xf32>
    %21 = arith.truncf %20 : vector<1x8x32xf32> to vector<1x8x32xbf16>
    %22 = vector.shape_cast %17 : vector<8x32xf32> to vector<1x8x32xf32>
    %23 = arith.truncf %22 : vector<1x8x32xf32> to vector<1x8x32xbf16>
    %24 = vector.extract_strided_slice %19 {offsets = [0, 0, 0], sizes = [1, 8, 8], strides = [1, 1, 1]} : vector<1x8x32xbf16> to vector<1x8x8xbf16>
    %25 = vector.extract_strided_slice %21 {offsets = [0, 0, 0], sizes = [1, 8, 8], strides = [1, 1, 1]} : vector<1x8x32xbf16> to vector<1x8x8xbf16>
    %26 = vector.extract_strided_slice %23 {offsets = [0, 0, 0], sizes = [1, 8, 8], strides = [1, 1, 1]} : vector<1x8x32xbf16> to vector<1x8x8xbf16>
    "tpu.trace_start"() <{level = 10 : i32, message = "bqd,bkd->bqk"}> : () -> ()
    %cst_16 = arith.constant dense<0.000000e+00> : vector<1x8x8xf32>
    %27 = tpu.matmul %24, %25, %cst_16 {dimension_numbers = #tpu.dot_dimension_numbers<[2], [2], [1], [1], [0, 0, 0, 1, 1, 1], [0], [0]>} : vector<1x8x8xbf16>, vector<1x8x8xbf16>, vector<1x8x8xf32> -> vector<1x8x8xf32>
    "tpu.trace_stop"() : () -> ()
    %cst_17 = arith.constant dense<0xFF800000> : vector<1x8xf32>
    %28 = vector.multi_reduction <maximumf>, %27, %cst_17 [2] : vector<1x8x8xf32> to vector<1x8xf32>
    %29 = vector.shape_cast %28 : vector<1x8xf32> to vector<1x8x1xf32>
    %30 = vector.broadcast %29 : vector<1x8x1xf32> to vector<1x8x8xf32>
    %31 = arith.subf %27, %30 : vector<1x8x8xf32>
    %32 = math.exp %31 : vector<1x8x8xf32>
    %cst_18 = arith.constant dense<0.000000e+00> : vector<1x8xf32>
    %33 = vector.multi_reduction <add>, %32, %cst_18 [2] : vector<1x8x8xf32> to vector<1x8xf32>
    %34 = vector.shape_cast %33 : vector<1x8xf32> to vector<1x8x1xf32>
    %35 = tpu.reciprocal %34 {approx = true} : vector<1x8x1xf32> -> vector<1x8x1xf32>
    %36 = arith.truncf %32 : vector<1x8x8xf32> to vector<1x8x8xbf16>
    "tpu.trace_start"() <{level = 10 : i32, message = "bqk,bkd->bqd"}> : () -> ()
    %cst_19 = arith.constant dense<0.000000e+00> : vector<1x8x8xf32>
    %37 = tpu.matmul %36, %26, %cst_19 {dimension_numbers = #tpu.dot_dimension_numbers<[2], [1], [1], [2], [0, 0, 0, 1, 1, 2], [0], [0]>} : vector<1x8x8xbf16>, vector<1x8x8xbf16>, vector<1x8x8xf32> -> vector<1x8x8xf32>
    "tpu.trace_stop"() : () -> ()
    %38 = vector.broadcast %35 : vector<1x8x1xf32> to vector<1x8x8xf32>
    %39 = arith.mulf %37, %38 : vector<1x8x8xf32>
    %40 = vector.extract_strided_slice %19 {offsets = [0, 0, 8], sizes = [1, 8, 8], strides = [1, 1, 1]} : vector<1x8x32xbf16> to vector<1x8x8xbf16>
    %41 = vector.extract_strided_slice %21 {offsets = [0, 0, 8], sizes = [1, 8, 8], strides = [1, 1, 1]} : vector<1x8x32xbf16> to vector<1x8x8xbf16>
    %42 = vector.extract_strided_slice %23 {offsets = [0, 0, 8], sizes = [1, 8, 8], strides = [1, 1, 1]} : vector<1x8x32xbf16> to vector<1x8x8xbf16>
    "tpu.trace_start"() <{level = 10 : i32, message = "bqd,bkd->bqk"}> : () -> ()
    %cst_20 = arith.constant dense<0.000000e+00> : vector<1x8x8xf32>
    %43 = tpu.matmul %40, %41, %cst_20 {dimension_numbers = #tpu.dot_dimension_numbers<[2], [2], [1], [1], [0, 0, 0, 1, 1, 1], [0], [0]>} : vector<1x8x8xbf16>, vector<1x8x8xbf16>, vector<1x8x8xf32> -> vector<1x8x8xf32>
    "tpu.trace_stop"() : () -> ()
    %cst_21 = arith.constant dense<0xFF800000> : vector<1x8xf32>
    %44 = vector.multi_reduction <maximumf>, %43, %cst_21 [2] : vector<1x8x8xf32> to vector<1x8xf32>
    %45 = vector.shape_cast %44 : vector<1x8xf32> to vector<1x8x1xf32>
    %46 = vector.broadcast %45 : vector<1x8x1xf32> to vector<1x8x8xf32>
    %47 = arith.subf %43, %46 : vector<1x8x8xf32>
    %48 = math.exp %47 : vector<1x8x8xf32>
    %cst_22 = arith.constant dense<0.000000e+00> : vector<1x8xf32>
    %49 = vector.multi_reduction <add>, %48, %cst_22 [2] : vector<1x8x8xf32> to vector<1x8xf32>
    %50 = vector.shape_cast %49 : vector<1x8xf32> to vector<1x8x1xf32>
    %51 = tpu.reciprocal %50 {approx = true} : vector<1x8x1xf32> -> vector<1x8x1xf32>
    %52 = arith.truncf %48 : vector<1x8x8xf32> to vector<1x8x8xbf16>
    "tpu.trace_start"() <{level = 10 : i32, message = "bqk,bkd->bqd"}> : () -> ()
    %cst_23 = arith.constant dense<0.000000e+00> : vector<1x8x8xf32>
    %53 = tpu.matmul %52, %42, %cst_23 {dimension_numbers = #tpu.dot_dimension_numbers<[2], [1], [1], [2], [0, 0, 0, 1, 1, 2], [0], [0]>} : vector<1x8x8xbf16>, vector<1x8x8xbf16>, vector<1x8x8xf32> -> vector<1x8x8xf32>
    "tpu.trace_stop"() : () -> ()
    %54 = vector.broadcast %51 : vector<1x8x1xf32> to vector<1x8x8xf32>
    %55 = arith.mulf %53, %54 : vector<1x8x8xf32>
    %56 = vector.extract_strided_slice %19 {offsets = [0, 0, 16], sizes = [1, 8, 8], strides = [1, 1, 1]} : vector<1x8x32xbf16> to vector<1x8x8xbf16>
    %57 = vector.extract_strided_slice %21 {offsets = [0, 0, 16], sizes = [1, 8, 8], strides = [1, 1, 1]} : vector<1x8x32xbf16> to vector<1x8x8xbf16>
    %58 = vector.extract_strided_slice %23 {offsets = [0, 0, 16], sizes = [1, 8, 8], strides = [1, 1, 1]} : vector<1x8x32xbf16> to vector<1x8x8xbf16>
    "tpu.trace_start"() <{level = 10 : i32, message = "bqd,bkd->bqk"}> : () -> ()
    %cst_24 = arith.constant dense<0.000000e+00> : vector<1x8x8xf32>
    %59 = tpu.matmul %56, %57, %cst_24 {dimension_numbers = #tpu.dot_dimension_numbers<[2], [2], [1], [1], [0, 0, 0, 1, 1, 1], [0], [0]>} : vector<1x8x8xbf16>, vector<1x8x8xbf16>, vector<1x8x8xf32> -> vector<1x8x8xf32>
    "tpu.trace_stop"() : () -> ()
    %cst_25 = arith.constant dense<0xFF800000> : vector<1x8xf32>
    %60 = vector.multi_reduction <maximumf>, %59, %cst_25 [2] : vector<1x8x8xf32> to vector<1x8xf32>
    %61 = vector.shape_cast %60 : vector<1x8xf32> to vector<1x8x1xf32>
    %62 = vector.broadcast %61 : vector<1x8x1xf32> to vector<1x8x8xf32>
    %63 = arith.subf %59, %62 : vector<1x8x8xf32>
    %64 = math.exp %63 : vector<1x8x8xf32>
    %cst_26 = arith.constant dense<0.000000e+00> : vector<1x8xf32>
    %65 = vector.multi_reduction <add>, %64, %cst_26 [2] : vector<1x8x8xf32> to vector<1x8xf32>
    %66 = vector.shape_cast %65 : vector<1x8xf32> to vector<1x8x1xf32>
    %67 = tpu.reciprocal %66 {approx = true} : vector<1x8x1xf32> -> vector<1x8x1xf32>
    %68 = arith.truncf %64 : vector<1x8x8xf32> to vector<1x8x8xbf16>
    "tpu.trace_start"() <{level = 10 : i32, message = "bqk,bkd->bqd"}> : () -> ()
    %cst_27 = arith.constant dense<0.000000e+00> : vector<1x8x8xf32>
    %69 = tpu.matmul %68, %58, %cst_27 {dimension_numbers = #tpu.dot_dimension_numbers<[2], [1], [1], [2], [0, 0, 0, 1, 1, 2], [0], [0]>} : vector<1x8x8xbf16>, vector<1x8x8xbf16>, vector<1x8x8xf32> -> vector<1x8x8xf32>
    "tpu.trace_stop"() : () -> ()
    %70 = vector.broadcast %67 : vector<1x8x1xf32> to vector<1x8x8xf32>
    %71 = arith.mulf %69, %70 : vector<1x8x8xf32>
    %72 = vector.extract_strided_slice %19 {offsets = [0, 0, 24], sizes = [1, 8, 8], strides = [1, 1, 1]} : vector<1x8x32xbf16> to vector<1x8x8xbf16>
    %73 = vector.extract_strided_slice %21 {offsets = [0, 0, 24], sizes = [1, 8, 8], strides = [1, 1, 1]} : vector<1x8x32xbf16> to vector<1x8x8xbf16>
    %74 = vector.extract_strided_slice %23 {offsets = [0, 0, 24], sizes = [1, 8, 8], strides = [1, 1, 1]} : vector<1x8x32xbf16> to vector<1x8x8xbf16>
    "tpu.trace_start"() <{level = 10 : i32, message = "bqd,bkd->bqk"}> : () -> ()
    %cst_28 = arith.constant dense<0.000000e+00> : vector<1x8x8xf32>
    %75 = tpu.matmul %72, %73, %cst_28 {dimension_numbers = #tpu.dot_dimension_numbers<[2], [2], [1], [1], [0, 0, 0, 1, 1, 1], [0], [0]>} : vector<1x8x8xbf16>, vector<1x8x8xbf16>, vector<1x8x8xf32> -> vector<1x8x8xf32>
    "tpu.trace_stop"() : () -> ()
    %cst_29 = arith.constant dense<0xFF800000> : vector<1x8xf32>
    %76 = vector.multi_reduction <maximumf>, %75, %cst_29 [2] : vector<1x8x8xf32> to vector<1x8xf32>
    %77 = vector.shape_cast %76 : vector<1x8xf32> to vector<1x8x1xf32>
    %78 = vector.broadcast %77 : vector<1x8x1xf32> to vector<1x8x8xf32>
    %79 = arith.subf %75, %78 : vector<1x8x8xf32>
    %80 = math.exp %79 : vector<1x8x8xf32>
    %cst_30 = arith.constant dense<0.000000e+00> : vector<1x8xf32>
    %81 = vector.multi_reduction <add>, %80, %cst_30 [2] : vector<1x8x8xf32> to vector<1x8xf32>
    %82 = vector.shape_cast %81 : vector<1x8xf32> to vector<1x8x1xf32>
    %83 = tpu.reciprocal %82 {approx = true} : vector<1x8x1xf32> -> vector<1x8x1xf32>
    %84 = arith.truncf %80 : vector<1x8x8xf32> to vector<1x8x8xbf16>
    "tpu.trace_start"() <{level = 10 : i32, message = "bqk,bkd->bqd"}> : () -> ()
    %cst_31 = arith.constant dense<0.000000e+00> : vector<1x8x8xf32>
    %85 = tpu.matmul %84, %74, %cst_31 {dimension_numbers = #tpu.dot_dimension_numbers<[2], [1], [1], [2], [0, 0, 0, 1, 1, 2], [0], [0]>} : vector<1x8x8xbf16>, vector<1x8x8xbf16>, vector<1x8x8xf32> -> vector<1x8x8xf32>
    "tpu.trace_stop"() : () -> ()
    %86 = vector.broadcast %83 : vector<1x8x1xf32> to vector<1x8x8xf32>
    %87 = arith.mulf %85, %86 : vector<1x8x8xf32>
    %88 = tpu.concatenate %39, %55, %71, %87 in 2 : vector<1x8x8xf32>, vector<1x8x8xf32>, vector<1x8x8xf32>, vector<1x8x8xf32> -> vector<1x8x32xf32>
    %89 = arith.addf %88, %0 : vector<1x8x32xf32>
    %90 = vector.shape_cast %89 : vector<1x8x32xf32> to vector<8x32xf32>
    %91 = arith.truncf %90 : vector<8x32xf32> to vector<8x32xbf16>
    %c0_32 = arith.constant 0 : index
    %c0_33 = arith.constant 0 : index
    %92 = vector.load %arg8[%c0_32, %c0_33] : memref<32x64xbf16, #tpu.memory_space<vmem>>, vector<32x64xbf16>
    %cst_34 = arith.constant dense<0.000000e+00> : vector<8x64xf32>
    %93 = tpu.matmul %91, %92, %cst_34 {dimension_numbers = #tpu.dot_dimension_numbers<[1], [0], [0], [1], [0, 0, 1, 1], [], []>} : vector<8x32xbf16>, vector<32x64xbf16>, vector<8x64xf32> -> vector<8x64xf32>
    %c0_35 = arith.constant 0 : index
    %c0_36 = arith.constant 0 : index
    %94 = vector.load %arg9[%c0_35, %c0_36] : memref<1x64xf32, #tpu.memory_space<vmem>>, vector<1x64xf32>
    %95 = vector.broadcast %94 : vector<1x64xf32> to vector<8x64xf32>
    %96 = arith.addf %93, %95 : vector<8x64xf32>
    %cst_37 = arith.constant 0.000000e+00 : f32
    %97 = vector.broadcast %cst_37 : f32 to vector<8x64xf32>
    %98 = arith.cmpf oge, %96, %97 : vector<8x64xf32>
    %cst_38 = arith.constant 0.00999999977 : f32
    %99 = vector.broadcast %cst_38 : f32 to vector<8x64xf32>
    %100 = arith.mulf %99, %96 : vector<8x64xf32>
    %101 = arith.select %98, %96, %100 : vector<8x64xi1>, vector<8x64xf32>
    %102 = arith.truncf %101 : vector<8x64xf32> to vector<8x64xbf16>
    %c0_39 = arith.constant 0 : index
    %c0_40 = arith.constant 0 : index
    %103 = vector.load %arg10[%c0_39, %c0_40] : memref<64x32xbf16, #tpu.memory_space<vmem>>, vector<64x32xbf16>
    %cst_41 = arith.constant dense<0.000000e+00> : vector<8x32xf32>
    %104 = tpu.matmul %102, %103, %cst_41 {dimension_numbers = #tpu.dot_dimension_numbers<[1], [0], [0], [1], [0, 0, 1, 1], [], []>} : vector<8x64xbf16>, vector<64x32xbf16>, vector<8x32xf32> -> vector<8x32xf32>
    %c0_42 = arith.constant 0 : index
    %c0_43 = arith.constant 0 : index
    %105 = vector.load %arg11[%c0_42, %c0_43] : memref<1x32xf32, #tpu.memory_space<vmem>>, vector<1x32xf32>
    %106 = vector.broadcast %105 : vector<1x32xf32> to vector<8x32xf32>
    %107 = arith.addf %104, %106 : vector<8x32xf32>
    %108 = vector.shape_cast %107 : vector<8x32xf32> to vector<1x8x32xf32>
    %c0_44 = arith.constant 0 : index
    %c0_45 = arith.constant 0 : index
    %c0_46 = arith.constant 0 : index
    %109 = vector.load %arg12[%c0_44, %c0_45, %c0_46] : memref<1x8x32xf32, #tpu.memory_space<vmem>>, vector<1x8x32xf32>
    tpu.vector_store %arg12[%c0_44, %c0_45, %c0_46], %108 {strides = array<i32>} : memref<1x8x32xf32, #tpu.memory_space<vmem>>, vector<1x8x32xf32>,
    return
  }
  func.func @transform_0(%arg0: i32) -> (i32, i32, i32) {
    %c0_i32 = arith.constant 0 : i32
    %c0_i32_0 = arith.constant 0 : i32
    %c0_i32_1 = arith.constant 0 : i32
    return %arg0, %c0_i32, %c0_i32_0 : i32, i32, i32
  }
  func.func @transform_1(%arg0: i32) -> (i32, i32) {
    %c0_i32 = arith.constant 0 : i32
    %c0_i32_0 = arith.constant 0 : i32
    %c0_i32_1 = arith.constant 0 : i32
    return %c0_i32, %c0_i32_0 : i32, i32
  }
  func.func @transform_2(%arg0: i32) -> (i32, i32) {
    %c0_i32 = arith.constant 0 : i32
    %c0_i32_0 = arith.constant 0 : i32
    %c0_i32_1 = arith.constant 0 : i32
    return %c0_i32, %c0_i32_0 : i32, i32
  }
  func.func @transform_3(%arg0: i32) -> (i32, i32) {
    %c0_i32 = arith.constant 0 : i32
    %c0_i32_0 = arith.constant 0 : i32
    %c0_i32_1 = arith.constant 0 : i32
    return %c0_i32, %c0_i32_0 : i32, i32
  }
  func.func @transform_4(%arg0: i32) -> (i32, i32) {
    %c0_i32 = arith.constant 0 : i32
    %c0_i32_0 = arith.constant 0 : i32
    %c0_i32_1 = arith.constant 0 : i32
    return %c0_i32, %c0_i32_0 : i32, i32
  }
  func.func @transform_5(%arg0: i32) -> (i32, i32) {
    %c0_i32 = arith.constant 0 : i32
    %c0_i32_0 = arith.constant 0 : i32
    %c0_i32_1 = arith.constant 0 : i32
    return %c0_i32, %c0_i32_0 : i32, i32
  }
  func.func @transform_6(%arg0: i32) -> (i32, i32) {
    %c0_i32 = arith.constant 0 : i32
    %c0_i32_0 = arith.constant 0 : i32
    %c0_i32_1 = arith.constant 0 : i32
    return %c0_i32, %c0_i32_0 : i32, i32
  }
  func.func @transform_7(%arg0: i32) -> (i32, i32) {
    %c0_i32 = arith.constant 0 : i32
    %c0_i32_0 = arith.constant 0 : i32
    %c0_i32_1 = arith.constant 0 : i32
    return %c0_i32, %c0_i32_0 : i32, i32
  }
  func.func @transform_8(%arg0: i32) -> (i32, i32) {
    %c0_i32 = arith.constant 0 : i32
    %c0_i32_0 = arith.constant 0 : i32
    %c0_i32_1 = arith.constant 0 : i32
    return %c0_i32, %c0_i32_0 : i32, i32
  }
  func.func @transform_9(%arg0: i32) -> (i32, i32) {
    %c0_i32 = arith.constant 0 : i32
    %c0_i32_0 = arith.constant 0 : i32
    %c0_i32_1 = arith.constant 0 : i32
    return %c0_i32, %c0_i32_0 : i32, i32
  }
  func.func @transform_10(%arg0: i32) -> (i32, i32) {
    %c0_i32 = arith.constant 0 : i32
    %c0_i32_0 = arith.constant 0 : i32
    %c0_i32_1 = arith.constant 0 : i32
    return %c0_i32, %c0_i32_0 : i32, i32
  }
  func.func @transform_11(%arg0: i32) -> (i32, i32, i32) {
    %c0_i32 = arith.constant 0 : i32
    %c0_i32_0 = arith.constant 0 : i32
    %c0_i32_1 = arith.constant 0 : i32
    return %arg0, %c0_i32, %c0_i32_0 : i32, i32, i32
  }
}

</mosaic_0001>

<bundles_post_ra>
// kernel: tpu_custom_call.1
= control target key start
LH: loop header
LB: loop body
LE: loop exit
PB: predicated region body
PF: predicated region fallthrough
CT: control target
= control target key end

     0   :  { %s2335_s0 = inlined_call_operand.vmem [shape: f32[2,8,32], index: 0, kind: input, shape index: {}]   ;;  %s2336_s1 = inlined_call_operand.vmem [shape: bf16[32,32], index: 1, kind: input, shape index: {}]   ;;  %s2337_s2 = inlined_call_operand.hbm [shape: f32[1,32], index: 2, kind: input, shape index: {}]   ;;  %s2338_s3 = inlined_call_operand.vmem [shape: bf16[32,32], index: 3, kind: input, shape index: {}]   ;;  %s2339_s4 = inlined_call_operand.hbm [shape: f32[1,32], index: 4, kind: input, shape index: {}]   ;;  %s2340_s5 = inlined_call_operand.hbm [shape: bf16[32,32], index: 5, kind: input, shape index: {}]   ;;  %s2341_s6 = inlined_call_operand.hbm [shape: f32[1,32], index: 6, kind: input, shape index: {}]   ;;  %s2342_s7 = inlined_call_operand.hbm [shape: bf16[32,64], index: 7, kind: input, shape index: {}]   ;;  %s2343_s8 = inlined_call_operand.hbm [shape: f32[1,64], index: 8, kind: input, shape index: {}]   ;;  %s2344_s9 = inlined_call_operand.vmem [shape: bf16[64,32], index: 9, kind: input, shape index: {}]   ;;  %s2345_s10 = inlined_call_operand.vmem [shape: f32[1,32], index: 10, kind: input, shape index: {}]   ;;  %s2346_s11 = inlined_call_operand.hbm [shape: f32[2,8,32], index: 11, kind: output, shape index: {}]  }
   0x1   :  { %2351 = sst [smem:[#allocation21_spill]] %s2337_s2 }
   0x2   :  { %2352 = sst [smem:[#allocation22_spill]] %s2339_s4 }
   0x3   :  { %16 = vsyncpa [#allocation3], 0 }
   0x4   :  { %17 = vsyncpa [#allocation6], 0 }
   0x5   :  { %18 = vsyncpa [#allocation9], 0 }
   0x6   :  { %19 = vsyncpa [#allocation12], 0 }
   0x7   :  { %20 = vsyncpa [#allocation4], 0 }
   0x8   :  { %22 = vsyncpa [#allocation4 + $0x1], 0  ;;  %s2032_s17 = smov 0   ;;  %s2034_s18 = smov 0  }
   0x9   :  { %s2036_s19 = smov 0   ;;  %s2038_s20 = smov 0  }
   0xa LB: > { %2353 = sst [smem:[#allocation19_spill]] %s1949_s19  ;;  %s2053_s21 = sadd.s32 4294967295, %s1953_s20   ;;  %s1953_s20 = sphi %s2038_s20, %s2377_s20   ;;  %s1949_s19 = sphi %s2036_s19, %s2374_s19   ;;  %s1945_s18 = sphi %s2034_s18, %s2376_s18   ;;  %s1941_s17 = sphi %s2032_s17, %s2375_s17  }
   0xb   : > { %s1406_s22 = sadd.s32 4294967294, %s1953_s20   ;;  %s2057_s23 = sadd.s32 1, %s1953_s20  }
   0xc   : > { %s271_s24 = sadd.s32 1, %s1949_s19  ;;  %s268_s25 = ssub.s32 %s1953_s20, %s2057_s23 }
   0xd   : > { %p281_p0 = scmp.ne.s32.totalorder %s1949_s19, %s1945_s18  ;;  %p269_p1 = scmp.eq.s32.totalorder %s268_s25, 0 }
   0xe   : > { %p282_p2 = scmp.eq.s32.totalorder %s2053_s21, 1  ;;  %p287_p3 = scmp.ne.s32.totalorder %s1945_s18, %s1941_s17 }
   0xf   : > { %p288_p4 = scmp.eq.s32.totalorder %s1406_s22, 1  ;;  %p1407_p7 = scmp.ge.s32.totalorder %s1953_s20, 1 }
  0x10   : > { %s2068_s26 = scalar_select %p269_p1, %s1949_s19, %s271_s24  }
  0x11   : > { %p2070_p5 = por %p282_p2, %p281_p0  ;;  %p2074_p6 = por %p288_p4, %p287_p3 }
  0x12   : > { %2354 = sst [smem:[#allocation20_spill]] %s2068_s26  ;;  %p295_p8 = scmp.lt.s32.totalorder %s1953_s20, 3 }
  0x13   : > { %s2355_s27 = scalar_select %p2070_p5, 1, 0 }
  0x14   : > { %s2356_s28 = scalar_select %p2074_p6, 1, 0 }
  0x15   : > { %p2347_p9 = scmp.eq.s32.totalorder %s2053_s21, 0  ;;  %p2081_p10 = pnand %p1407_p7, %p295_p8 }
  0x16   : > { %s1955_s30 = smov [#allocation5]   ;;  %s1956_s13 = smov [#allocation8]  }
  0x17   : > { %s2357_s29 = scalar_select %p2081_p10, 1, 0 }
  0x18   : > { %s325_s12 = sshll.u32 %s1955_s30, 4  ;;  %p1609_p11 = pneg %p2081_p10  ;;  %s326_s12 = int_to_ptr.vmem [resolvable:$true] %s325_s12 }
  0x19   : > { %s349_s14 = sshll.u32 %s1956_s13, 4  ;;  %s1957_s16 = smov [#allocation2]   ;;  %s350_s14 = int_to_ptr.vmem [resolvable:$true] %s349_s14 }
  0x1a   : > { %p2089_p12 = pnand %p2347_p9, %p1609_p11  ;;  %s311_s22 = sshll.u32 %s1957_s16, 4  ;;  %s2093_s22 = int_to_ptr.vmem [resolvable:$true] %s311_s22 }
  0x1b   : > { %s1732_s25 = scalar_lea.vmem %s326_s12, 16  ;;  %s1739_s30 = scalar_lea.vmem %s326_s12, 32 }
  0x1c   : > { %p2097_p13 = pneg %p2089_p12  ;;  %p1733_p0 = scmp.ne.s32.totalorder %s326_s12, %s1732_s25 }
  0x1d   : > { %p1740_p3 = scmp.lt.s32.totalorder %s326_s12, %s326_s12  ;;  %p1741_p4 = scmp.lt.s32.totalorder %s1739_s30, %s1732_s25 }
  0x1e   : > { %p1735_p1 = pnand %p1733_p0, %p2097_p13 }
  0x1f   : > { %p1742_p7 = por %p1741_p4, %p1740_p3 }
  0x20   : > { %p1736_p2 = pneg %p1735_p1 }
  0x22   : > { %p1743_p8 = pnand %p1742_p7, %p1736_p2 }
  0x24   : > { %1746 = shalt.err (!%p1743_p8)
}
  0x25   : > { %s2360_s4 = sld [smem:[#allocation22_spill]]  ;;  %s1758_s26 = scalar_lea.vmem %s350_s14, 16 }
  0x26   : > { %p1759_p11 = scmp.ne.s32.totalorder %s350_s14, %s1758_s26  ;;  %s1765_s19 = scalar_lea.vmem %s350_s14, 32 }
  0x27   : > { %p1766_p0 = scmp.lt.s32.totalorder %s350_s14, %s350_s14  ;;  %p1767_p1 = scmp.lt.s32.totalorder %s1765_s19, %s1758_s26 }
  0x28   : > { %p1761_p9 = pnand %p1759_p11, %p2097_p13 }
  0x29   : > { %p1768_p5 = por %p1767_p1, %p1766_p0 }
  0x2a   : > { %p1762_p6 = pneg %p1761_p9 }
  0x2b   : > { %1615 = dma.hbm_to_vmem [thread:$0]  (!%p2089_p12), %s2360_s4, 16, %s326_s12, [#allocation6]  }
  0x2c   : > { %p1769_p10 = pnand %p1768_p5, %p1762_p6 }
  0x2e   : > { %1772 = shalt.err (!%p1769_p10)
}
  0x2f   : > { %1621 = dma.hbm_to_vmem [thread:$0]  (!%p2089_p12), %s2341_s6, 16, %s350_s14, [#allocation9]  }
  0x30   : > { %s1784_s12 = scalar_lea.vmem %s2093_s22, 16  ;;  %s1791_s19 = scalar_lea.vmem %s2093_s22, 32 }
  0x31   : > { %p1785_p2 = scmp.ne.s32.totalorder %s2093_s22, %s1784_s12  ;;  %p1792_p5 = scmp.lt.s32.totalorder %s2093_s22, %s2093_s22 }
  0x32   : > { %p1793_p6 = scmp.lt.s32.totalorder %s1791_s19, %s1784_s12 }
  0x33   : > { %p1787_p9 = pnand %p1785_p2, %p2097_p13 }
  0x34   : > { %p1794_p10 = por %p1793_p6, %p1792_p5 }
  0x35   : > { %p1788_p3 = pneg %p1787_p9 }
  0x37   : > { %p1795_p4 = pnand %p1794_p10, %p1788_p3 }
  0x39   : > { %1798 = shalt.err (!%p1795_p4)
}
  0x3a   : > { %s2361_s2 = sld [smem:[#allocation21_spill]]  ;;  %s1958_s14 = smov [#allocation7]  }
  0x3b   : > { %s335_s16 = sshll.u32 %s1958_s14, 4  ;;  %s336_s16 = int_to_ptr.vmem [resolvable:$true] %s335_s16 }
  0x3c   : > { %s1810_s25 = scalar_lea.vmem %s336_s16, 256  ;;  %p1818_p0 = scmp.lt.s32.totalorder %s336_s16, %s336_s16 }
  0x3d   : > { %p1811_p7 = scmp.ne.s32.totalorder %s336_s16, %s1810_s25  ;;  %p1819_p1 = scmp.lt.s32.totalorder %s1810_s25, %s1810_s25 }
  0x3f   : > { %p1813_p8 = pnand %p1811_p7, %p2097_p13  ;;  %p1820_p2 = por %p1819_p1, %p1818_p0 }
  0x40   : > { %1612 = dma.hbm_to_vmem [thread:$0]  (!%p2089_p12), %s2361_s2, 16, %s2093_s22, [#allocation3]  }
  0x41   : > { %p1814_p11 = pneg %p1813_p8 }
  0x43   : > { %p1821_p9 = pnand %p1820_p2, %p1814_p11 }
  0x45   : > { %1824 = shalt.err (!%p1821_p9)
}
  0x46   : > { %s1959_s30 = smov 64   ;;  %s1960_s12 = smov 4  }
  0x47   : > { %1618 = dma.hbm_to_vmem [thread:$0]  (!%p2089_p12), %s2340_s5, 256, %s336_s16, [#allocation6], %s1959_s30, %s1959_s30, %s1960_s12  }
  0x48   : > { %s1961_s26 = smov [#allocation10]   ;;  %s1962_s14 = smov [#allocation11]  }
  0x49   : > { %s359_s13 = sshll.u32 %s1961_s26, 4  ;;  %s373_s2 = sshll.u32 %s1962_s14, 4  ;;  %s360_s13 = int_to_ptr.vmem [resolvable:$true] %s359_s13  ;;  %s374_s2 = int_to_ptr.vmem [resolvable:$true] %s373_s2 }
  0x4a   : > { %s1836_s4 = scalar_lea.vmem %s360_s13, 256  ;;  %p1844_p10 = scmp.lt.s32.totalorder %s360_s13, %s360_s13 }
  0x4b   : > { %p1837_p3 = scmp.ne.s32.totalorder %s360_s13, %s1836_s4  ;;  %p1845_p4 = scmp.lt.s32.totalorder %s1836_s4, %s1836_s4 }
  0x4d   : > { %p1839_p5 = pnand %p1837_p3, %p2097_p13  ;;  %p1846_p7 = por %p1845_p4, %p1844_p10 }
  0x4f   : > { %p1840_p6 = pneg %p1839_p5 }
  0x51   : > { %p1847_p8 = pnand %p1846_p7, %p1840_p6 }
  0x53   : > { %1850 = shalt.err (!%p1847_p8)
}
  0x54   : > { %1624 = dma.hbm_to_vmem [thread:$0]  (!%p2089_p12), %s2342_s7, 256, %s360_s13, [#allocation9], %s1959_s30, %s1959_s30, %s1960_s12  }
  0x55   : > { %s1862_s19 = scalar_lea.vmem %s374_s2, 16  ;;  %s1869_s22 = scalar_lea.vmem %s374_s2, 32 }
  0x56   : > { %p1863_p11 = scmp.ne.s32.totalorder %s374_s2, %s1862_s19  ;;  %p1870_p2 = scmp.lt.s32.totalorder %s374_s2, %s374_s2 }
  0x57   : > { %p1871_p9 = scmp.lt.s32.totalorder %s1869_s22, %s1862_s19 }
  0x58   : > { %p1865_p0 = pnand %p1863_p11, %p2097_p13 }
  0x59   : > { %p1872_p3 = por %p1871_p9, %p1870_p2 }
  0x5a   : > { %p1866_p1 = pneg %p1865_p0 }
  0x5c   : > { %p1873_p5 = pnand %p1872_p3, %p1866_p1 }
  0x5e   : > { %1876 = shalt.err (!%p1873_p5)
}
  0x5f   : > { %1627 = dma.hbm_to_vmem [thread:$0]  (!%p2089_p12), %s2343_s8, 16, %s374_s2, [#allocation12]  }
  0x60   : > { %p2362_p6 = scmp.ne.s32.totalorder %s2357_s29, 0 }
  0x61   : > { %p2363_p10 = scmp.eq.s32.totalorder (!%p2362_p6), %s2053_s21, 0 }
  0x62   : > { %399 = sbr.rel (%p2362_p6) target bundleno = 1543 (0x607), region = 64 }
  0x67   : > { %1920 = dma.done.wait (%p2363_p10), [#allocation3], 16   ;;  %p2364_p13 = pmov %p2363_p10 }
  0x68   : > { %p2365_p4 = pmov %p2363_p10 }
  0x69   : > { %1922 = vsyncadd (%p2364_p13), [#allocation3], 4294967280 }
  0x6a   : > { %1924 = dma.done.wait (%p2365_p4), [#allocation6], 272   ;;  %p2366_p7 = pmov %p2365_p4 }
  0x6b   : > { %p2367_p8 = pmov %p2365_p4 }
  0x6c   : > { %1926 = vsyncadd (%p2366_p7), [#allocation6], 4294967024 }
  0x6d   : > { %1928 = dma.done.wait (%p2367_p8), [#allocation9], 272   ;;  %p2368_p12 = pmov %p2365_p4 }
  0x6e   : > { %p2369_p11 = pmov %p2365_p4 }
  0x6f   : > { %1930 = vsyncadd (%p2368_p12), [#allocation9], 4294967024 }
  0x70   : > { %1932 = dma.done.wait (%p2369_p11), [#allocation12], 16   ;;  %p2370_p0 = pmov %p2365_p4 }
  0x71   : > { %p458_p1 = scmp.lt.s32.totalorder %s2053_s21, 1  ;;  %v1963_v0 = vmov 0.0   ;;  %vm1964_vm0 = vmmov 0   ;;  %v1693_v1 = vld [vmem:[%s2336_s1 + $0x8] sm:$0xff]   ;;  %v1694_v2 = vld [vmem:[%s2336_s1] sm:$0xff]   ;;  %vm488_vm1 = vcmask 261120  }
  0x72   : > { %1934 = vsyncadd (%p2370_p0), [#allocation12], 4294967280  ;;  %1491 = vmatprep.subr.bf16.mxu1 %v1963_v0  ;;  %1495 = vmatprep.mubr.msk.bf16.mxu1 %vm1964_vm0, %v1963_v0  ;;  %v1695_v4 = vld [vmem:[%s2338_s3 + $0x8] sm:$0xff]   ;;  %v1696_v6 = vld [vmem:[%s2338_s3] sm:$0xff]   ;;  %vm661_vm2 = vcmask 64512   ;;  %s1965_s26 = smov 112  }
  0x73   : > { %s459_s2 = scalar_select %p458_p1, %s2053_s21, 1  ;;  %1507 = vmatprep.subr.bf16.mxu0 %v1963_v0  ;;  %1511 = vmatprep.mubr.msk.bf16.mxu0 %vm1964_vm0, %v1963_v0  ;;  %v1428_v11 = vld [vmem:[#allocation5] ss:$0 sm:$0xff]  ;;  %v1424_v12 = vld [vmem:[#allocation2] ss:$0 sm:$0xff]  ;;  %v1697_v22 = vld [vmem:[#allocation7 + $0x8] sm:$0xff]  }
  0x74   : > { %1492 = vmatpush3.bf16.msra.mxu1 %v1693_v1  ;;  %1508 = vmatpush3.bf16.msra.mxu0 %v1697_v22  ;;  %v1698_v23 = vld [vmem:[#allocation7] sm:$0xff]   ;;  %v1432_v38 = vld [vmem:[#allocation8] ss:$0 sm:$0xff]  ;;  %vm722_vm3 = vcmask 1043456   ;;  %s1968_s15 = smov 8   ;;  %s1969_s24 = smov 16  }
  0x75   : > { %s1423_s29 = sshll.u32 %s459_s2, 3  ;;  %1493 = vmatprep.subr.bf16.mxu1 %v1963_v0  ;;  %s1966_s2 = smov 120   ;;  %1509 = vmatprep.subr.bf16.mxu0 %v1963_v0  ;;  %vm1113_vm4 = vcmask 130048   ;;  %vm1115_vm5 = vcmask 195584   ;;  %vm1228_vm7 = vcmask 523264  }
  0x76   : > { %s461_s30 = scalar_lea.vmem %s2335_s0, %s1423_s29  ;;  %s1967_s29 = smov 104  }
  0x77   : > { %v2184_v3 = vld [vmem:[%s461_s30] sm:$0xff]  ;;  %s1970_s25 = smov 24   ;;  %p2371_p9 = scmp.ne.s32.totalorder %s2355_s27, 0 }
  0x78   : > { %v464_v5 = vpack.c.bf16 %v2184_v3, %v2184_v3  ;;  %1494 = vmatpush3.bf16.msra.mxu1 %v1694_v2  ;;  %1510 = vmatpush3.bf16.msra.mxu0 %v1698_v23  ;;  %s1971_s19 = smov [#allocation13]  }
  0x79   : > { %1499 = vmatprep.subr.bf16.mxu1 %v1963_v0  ;;  %1521 = vmatprep.subr.bf16.mxu0 %v1963_v0  ;;  %s1881_s22 = sshll.u32 %s1971_s19, 4  ;;  %s1882_s22 = int_to_ptr.vmem [resolvable:$false] %s1881_s22 }
  0x7a   : > { %s1883_s4 = scalar_lea.vmem %s1882_s22, 256 }
  0x7b   : > { %1496 = vmatmul.mubr.msk.bf16.vlgmr.msra.gmra.mxu1 %vm488_vm1, %v464_v5  ;;  %1512 = vmatmul.mubr.msk.bf16.vlgmr.msra.gmra.mxu0 %vm488_vm1, %v464_v5 }
  0x7c   : > { %1500 = vmatpush3.bf16.msra.mxu1 %v1695_v4  ;;  %1503 = vmatprep.mubr.msk.bf16.mxu1 %vm1964_vm0, %v1963_v0 }
  0x7d   : > { %1501 = vmatprep.subr.bf16.mxu1 %v1963_v0  ;;  %1523 = vmatprep.mubr.msk.bf16.mxu0 %vm1964_vm0, %v1963_v0 }
  0x80   : > { %1502 = vmatpush3.bf16.msra.mxu1 %v1696_v6 }
  0x81   : > { %1515 = vmatprep.subr.bf16.mxu1 %v1963_v0 }
  0x83   : > { %1504 = vmatmul.mubr.msk.bf16.vlgmr.msra.gmra.mxu1 %vm488_vm1, %v464_v5 }
  0x84   : > { %1517 = vmatprep.mubr.msk.bf16.mxu1 %vm1964_vm0, %v1963_v0 }
 0x13b   : > { %v526_v7 = vpop.f32.mrf.mxu1  ;;  %v652_v39 = vpop.f32.mrf.mxu0 }
 0x13c   : > { %v527_v16 = vadd.f32 %v1424_v12, %v526_v7  ;;  %v653_v40 = vadd.f32 %v1432_v38, %v652_v39 }
 0x13d   : > { %v1497_v8 = vpop.f32.mrf.mxu1  ;;  %v1513_v41 = vpop.f32.mrf.mxu0 }
 0x13e   : > { %v658_v21 = vpack.c.bf16 %v527_v16, %v527_v16  ;;  %v660_v42 = vpack.c.bf16 %v653_v40, %v653_v40 }
 0x13f   : > { %v529_v9 = vpop.f32.mrf.mxu1  ;;  %v655_v43 = vpop.f32.mrf.mxu0 }
 0x140   : > { %v724_v44 = vsel %vm722_vm3, %v660_v42, 0  ;;  %v1700_v43 = vld [vmem:[#allocation10] sm:$0xff]  }
 0x141   : > { %v1498_v10 = vpop.f32.mrf.mxu1  ;;  %v1514_v45 = vpop.f32.mrf.mxu0  ;;  %1522 = vmatpush3.bf16.msra.mxu0 %v724_v44 }
 0x142   : > { %1533 = vmatprep.subr.bf16.mxu0 %v1963_v0 }
 0x143   : > { %v589_v13 = vpop.f32.mrf.mxu1 }
 0x144   : > { %v590_v14 = vadd.f32 %v1428_v11, %v589_v13 }
 0x145   : > { %v1505_v15 = vpop.f32.mrf.mxu1 }
 0x146   : > { %v659_v17 = vpack.c.bf16 %v590_v14, %v590_v14 }
 0x147   : > { %v592_v18 = vpop.f32.mrf.mxu1 }
 0x148   : > { %882 = vrot.lane.b32.xlu1 %v659_v17, %s1965_s26  ;;  %771 = vrot.lane.b32.xlu0 %v659_v17, %s1966_s2  ;;  %v666_v19 = vsel %vm661_vm2, %v659_v17, 0 }
 0x149   : > { %v1506_v20 = vpop.f32.mrf.mxu1  ;;  %1516 = vmatpush3.bf16.xpose.msra.mxu1 %v666_v19 }
 0x14a   : > { %1527 = vmatprep.subr.bf16.mxu1 %v1963_v0 }
 0x14c   : > { %880 = vrot.lane.b32.xlu1 %v658_v21, %s1965_s26  ;;  %768 = vrot.lane.b32.xlu0 %v658_v21, %s1966_s2 }
 0x150   : > { %990 = vrot.lane.b32.xlu1 %v658_v21, %s1967_s29  ;;  %992 = vrot.lane.b32.xlu0 %v659_v17, %s1967_s29 }
 0x151   : > { %1518 = vmatmul.mubr.msk.bf16.vlgmr.msra.gmra.mxu1 %vm661_vm2, %v658_v21 }
 0x152   : > { %1529 = vmatprep.mubr.msk.bf16.mxu1 %vm1964_vm0, %v1963_v0 }
 0x1ba   : > { %v772_v24 = vpop.permute.xlu0 %771  ;;  %v883_v26 = vpop.permute.xlu1 %882 }
 0x1bb   : > { %v777_v25 = vsel %vm661_vm2, %v772_v24, 0  ;;  %v888_v28 = vsel %vm661_vm2, %v883_v26, 0 }
 0x1bc   : > { %1528 = vmatpush3.bf16.xpose.msra.mxu1 %v777_v25 }
 0x1bd   : > { %1539 = vmatprep.subr.bf16.mxu1 %v1963_v0 }
 0x1be   : > { %v769_v27 = vpop.permute.xlu0 %768  ;;  %v881_v30 = vpop.permute.xlu1 %880 }
 0x1c2   : > { %v993_v29 = vpop.permute.xlu0 %992  ;;  %v991_v32 = vpop.permute.xlu1 %990 }
 0x1c3   : > { %1530 = vmatmul.mubr.msk.bf16.vlgmr.msra.gmra.mxu1 %vm661_vm2, %v769_v27  ;;  %v998_v31 = vsel %vm661_vm2, %v993_v29, 0 }
 0x1c4   : > { %1540 = vmatpush3.bf16.xpose.msra.mxu1 %v888_v28  ;;  %1541 = vmatprep.mubr.msk.bf16.mxu1 %vm1964_vm0, %v1963_v0 }
 0x1c5   : > { %1551 = vmatprep.subr.bf16.mxu1 %v1963_v0 }
 0x1cb   : > { %1542 = vmatmul.mubr.msk.bf16.vlgmr.msra.gmra.mxu1 %vm661_vm2, %v881_v30 }
 0x1cc   : > { %1552 = vmatpush3.bf16.xpose.msra.mxu1 %v998_v31  ;;  %1553 = vmatprep.mubr.msk.bf16.mxu1 %vm1964_vm0, %v1963_v0 }
 0x1cd   : > { %1563 = vmatprep.subr.bf16.mxu1 %v1963_v0 }
 0x1d3   : > { %1554 = vmatmul.mubr.msk.bf16.vlgmr.msra.gmra.mxu1 %vm661_vm2, %v991_v32 }
 0x1d4   : > { %1567 = vmatprep.mubr.msk.bf16.mxu1 %vm1964_vm0, %v1963_v0 }
 0x211   : > { %v702_v33 = vpop.f32.mrf.mxu1 }
 0x212   : > { %v708_v34 = vsel %vm661_vm2, %v702_v33, -inf }
 0x213   : > { %709 = vmax.xlane.f32.xlu0 %v708_v34  ;;  %v1519_v35 = vpop.f32.mrf.mxu1 }
 0x214   : > { %v1699_v35 = vld [vmem:[#allocation10 + $0x8] sm:$0xff]  }
 0x215   : > { %v705_v36 = vpop.f32.mrf.mxu1  ;;  %1564 = vmatpush3.bf16.msra.mxu1 %v1699_v35 }
 0x216   : > { %1565 = vmatprep.subr.bf16.mxu1 %v1963_v0 }
 0x217   : > { %v1520_v37 = vpop.f32.mrf.mxu1 }
 0x219   : > { %1566 = vmatpush3.bf16.msra.mxu1 %v1700_v43 }
 0x283   : > { %v813_v46 = vpop.f32.mrf.mxu1 }
 0x284   : > { %v819_v47 = vsel %vm661_vm2, %v813_v46, -inf }
 0x285   : > { %820 = vmax.xlane.f32.xlu1 %v819_v47  ;;  %v1531_v48 = vpop.f32.mrf.mxu1 }
 0x286   : > { %v1701_v48 = vld [vmem:[%s2344_s9 + $0x18] sm:$0xff]  }
 0x287   : > { %v816_v49 = vpop.f32.mrf.mxu1 }
 0x289   : > { %v1532_v50 = vpop.f32.mrf.mxu1 }
 0x28a   : > { %v1702_v50 = vld [vmem:[%s2344_s9 + $0x10] sm:$0xff]  }
 0x28b   : > { %v924_v51 = vpop.f32.mrf.mxu1 }
 0x28c   : > { %v930_v52 = vsel %vm661_vm2, %v924_v51, -inf }
 0x28d   : > { %931 = vmax.xlane.f32.xlu0 %v930_v52  ;;  %v1543_v53 = vpop.f32.mrf.mxu1 }
 0x28f   : > { %v927_v54 = vpop.f32.mrf.mxu1 }
 0x291   : > { %v1544_v55 = vpop.f32.mrf.mxu1 }
 0x293   : > { %v1034_v56 = vpop.f32.mrf.mxu1 }
 0x294   : > { %v1040_v57 = vsel %vm661_vm2, %v1034_v56, -inf }
 0x295   : > { %1041 = vmax.xlane.f32.xlu0 %v1040_v57  ;;  %v1555_v58 = vpop.f32.mrf.mxu1 }
 0x296   : > { %831 = vrot.lane.b32.xlu1 %v660_v42, %s1966_s2 }
 0x297   : > { %v1037_v59 = vpop.f32.mrf.mxu1 }
 0x299   : > { %v1556_v60 = vpop.f32.mrf.mxu1 }
 0x29a   : > { %1051 = vrot.lane.b32.xlu1 %v660_v42, %s1967_s29 }
 0x29c   : > { %v710_v61 = vpop.xlane.xlu0 %709 }
 0x29d   : > { %v711_v62 = vsub.f32 %v702_v33, %v710_v61 }
 0x29f   : > { %v712_v63 = vmul.f32 1.442695, %v711_v62 }
 0x2a1   : > { %1705 = vpow2.f32 %v712_v63 }
 0x2ab   : > { %941 = vrot.lane.b32.xlu0 %v660_v42, %s1965_s26  ;;  %s455_s26 = sand.u32 1, %s1945_s18  }
 0x2ac   : > { %s1422_s2 = sshll.u32 %s455_s26, 3  ;;  %s1274_s16 = scalar_lea.sflag [#allocation4], %s455_s26 }
 0x2ad   : > { %s457_s30 = scalar_lea.vmem [#allocation13], %s1422_s2 }
 0x2ae   : > { %v1706_v1 = vpop.eup %1705  ;;  %s1287_s12 = sshll.u32 %s457_s30, 4  ;;  %s2295_s12 = int_to_ptr.vmem [resolvable:$true] %s1287_s12 }
 0x2af   : > { %v718_v2 = vpack.c.bf16 %v1706_v1, %v1706_v1  ;;  %v714_v20 = vsel %vm661_vm2, %v1706_v1, 0.0  ;;  %p1884_p6 = scmp.lt.s32.totalorder %s2295_s12, %s1882_s22 }
 0x2b1   : > { %1524 = vmatmul.mubr.msk.bf16.vlgmr.msra.gmra.mxu0 %vm661_vm2, %v718_v2 }
 0x2b2   : > { %1535 = vmatprep.mubr.msk.bf16.mxu0 %vm1964_vm0, %v1963_v0 }
 0x30e   : > { %v821_v4 = vpop.xlane.xlu1 %820 }
 0x30f   : > { %v822_v5 = vsub.f32 %v813_v46, %v821_v4 }
 0x311   : > { %v823_v6 = vmul.f32 1.442695, %v822_v5 }
 0x312   : > { %v832_v7 = vpop.permute.xlu1 %831 }
 0x313   : > { %1707 = vpow2.f32 %v823_v6  ;;  %v837_v8 = vsel %vm722_vm3, %v832_v7, 0  ;;  %v1703_v7 = vld [vmem:[%s2344_s9 + $0x8] sm:$0xff]  }
 0x314   : > { %1534 = vmatpush3.bf16.msra.mxu0 %v837_v8  ;;  %v1704_v8 = vld [vmem:[%s2344_s9] sm:$0xff]  }
 0x315   : > { %1545 = vmatprep.subr.bf16.mxu0 %v1963_v0 }
 0x316   : > { %v932_v9 = vpop.xlane.xlu0 %931  ;;  %v1052_v22 = vpop.permute.xlu1 %1051 }
 0x317   : > { %v933_v10 = vsub.f32 %v924_v51, %v932_v9  ;;  %v1057_v25 = vsel %vm722_vm3, %v1052_v22, 0  ;;  %v1444_v9 = vld [vmem:[#allocation11] ss:$0 sm:$0xff] }
 0x319   : > { %v934_v11 = vmul.f32 1.442695, %v933_v10 }
 0x31b   : > { %1709 = vpow2.f32 %v934_v11 }
 0x31e   : > { %v1042_v12 = vpop.xlane.xlu0 %1041 }
 0x31f   : > { %v1043_v13 = vsub.f32 %v1034_v56, %v1042_v12 }
 0x320   : > { %v1708_v14 = vpop.eup %1707 }
 0x321   : > { %v1044_v15 = vmul.f32 1.442695, %v1043_v13  ;;  %v825_v16 = vsel %vm661_vm2, %v1708_v14, 0.0  ;;  %v829_v17 = vpack.c.bf16 %v1708_v14, %v1708_v14 }
 0x322   : > { %826 = vadd.xlane.f32.xlu1 %v825_v16  ;;  %v942_v18 = vpop.permute.xlu0 %941 }
 0x323   : > { %1711 = vpow2.f32 %v1044_v15  ;;  %v947_v19 = vsel %vm722_vm3, %v942_v18, 0  ;;  %1536 = vmatmul.mubr.msk.bf16.vlgmr.msra.gmra.mxu0 %vm661_vm2, %v829_v17 }
 0x324   : > { %1546 = vmatpush3.bf16.msra.mxu0 %v947_v19  ;;  %1547 = vmatprep.mubr.msk.bf16.mxu0 %vm1964_vm0, %v1963_v0 }
 0x325   : > { %1557 = vmatprep.subr.bf16.mxu0 %v1963_v0 }
 0x326   : > { %715 = vadd.xlane.f32.xlu1 %v714_v20 }
 0x328   : > { %v1710_v21 = vpop.eup %1709 }
 0x329   : > { %v936_v23 = vsel %vm661_vm2, %v1710_v21, 0.0  ;;  %v940_v24 = vpack.c.bf16 %v1710_v21, %v1710_v21 }
 0x32a   : > { %937 = vadd.xlane.f32.xlu0 %v936_v23 }
 0x32b   : > { %1548 = vmatmul.mubr.msk.bf16.vlgmr.msra.gmra.mxu0 %vm661_vm2, %v940_v24 }
 0x32c   : > { %1558 = vmatpush3.bf16.msra.mxu0 %v1057_v25  ;;  %1559 = vmatprep.mubr.msk.bf16.mxu0 %vm1964_vm0, %v1963_v0 }
 0x32d   : > { %1571 = vmatprep.subr.bf16.mxu0 %v1963_v0 }
 0x330   : > { %v1712_v26 = vpop.eup %1711 }
 0x331   : > { %v1046_v27 = vsel %vm661_vm2, %v1712_v26, 0.0  ;;  %v1050_v28 = vpack.c.bf16 %v1712_v26, %v1712_v26 }
 0x332   : > { %1047 = vadd.xlane.f32.xlu0 %v1046_v27 }
 0x333   : > { %1560 = vmatmul.mubr.msk.bf16.vlgmr.msra.gmra.mxu0 %vm661_vm2, %v1050_v28 }
 0x334   : > { %1579 = vmatprep.mubr.msk.bf16.mxu0 %vm1964_vm0, %v1963_v0  ;;  %1572 = vmatpush3.bf16.msra.mxu0 %v1701_v48 }
 0x335   : > { %1573 = vmatprep.subr.bf16.mxu0 %v1963_v0 }
 0x338   : > { %1574 = vmatpush3.bf16.msra.mxu0 %v1702_v50 }
 0x339   : > { %1575 = vmatprep.subr.bf16.mxu0 %v1963_v0 }
 0x33c   : > { %1576 = vmatpush3.bf16.msra.mxu0 %v1703_v7 }
 0x33d   : > { %1577 = vmatprep.subr.bf16.mxu0 %v1963_v0  ;;  %v1448_v0 = vld [vmem:[%s2345_s10] ss:$0 sm:$0xff] }
 0x340   : > { %1578 = vmatpush3.bf16.msra.mxu0 %v1704_v8 }
 0x371   : > { %v760_v29 = vpop.f32.mrf.mxu0 }
 0x373   : > { %v1525_v30 = vpop.f32.mrf.mxu0 }
 0x375   : > { %v763_v31 = vpop.f32.mrf.mxu0 }
 0x377   : > { %v1526_v32 = vpop.f32.mrf.mxu0 }
 0x3ab   : > { %v827_v33 = vpop.xlane.xlu1 %826 }
 0x3ac   : > { %1713 = vrcp.f32 %v827_v33 }
 0x3af   : > { %v716_v58 = vpop.xlane.xlu1 %715 }
 0x3b3   : > { %v938_v34 = vpop.xlane.xlu0 %937 }
 0x3b4   : > { %1715 = vrcp.f32 %v938_v34 }
 0x3b9   : > { %v1714_v36 = vpop.eup %1713 }
 0x3bb   : > { %v1048_v37 = vpop.xlane.xlu0 %1047 }
 0x3bc   : > { %1717 = vrcp.f32 %v1048_v37 }
 0x3bd   : > { %1719 = vrcp.f32 %v716_v58 }
 0x3c1   : > { %v1716_v44 = vpop.eup %1715 }
 0x3c9   : > { %v1718_v52 = vpop.eup %1717 }
 0x3ca   : > { %v1720_v59 = vpop.eup %1719 }
 0x3cb   : > { %v766_v62 = vmul.f32 %v1720_v59, %v760_v29 }
 0x3e3   : > { %v873_v38 = vpop.f32.mrf.mxu0 }
 0x3e4   : > { %v879_v39 = vmul.f32 %v1714_v36, %v873_v38 }
 0x3e5   : > { %v1537_v40 = vpop.f32.mrf.mxu0 }
 0x3e6   : > { %1101 = vrot.lane.b32.xlu0 %v879_v39, %s1968_s15 }
 0x3e7   : > { %v876_v41 = vpop.f32.mrf.mxu0 }
 0x3e9   : > { %v1538_v42 = vpop.f32.mrf.mxu0 }
 0x3eb   : > { %v983_v45 = vpop.f32.mrf.mxu0 }
 0x3ec   : > { %v989_v46 = vmul.f32 %v1716_v44, %v983_v45 }
 0x3ed   : > { %v1549_v47 = vpop.f32.mrf.mxu0 }
 0x3ee   : > { %1105 = vrot.lane.b32.xlu1 %v989_v46, %s1969_s24  ;;  %s1455_s24 = sshll.u32 %s2053_s21, 7  ;;  %s1877_s21 = scalar_lea.vmem %s2295_s12, 128 }
 0x3ef   : > { %v986_v49 = vpop.f32.mrf.mxu0  ;;  %p1878_p2 = scmp.ne.s32.totalorder %s2295_s12, %s1877_s21  ;;  %p1885_p10 = scmp.lt.s32.totalorder %s1883_s4, %s1877_s21 }
 0x3f1   : > { %v1550_v51 = vpop.f32.mrf.mxu0  ;;  %p1879_p3 = pnand %p1878_p2, %p2371_p9  ;;  %p1886_p13 = por %p1885_p10, %p1884_p6 }
 0x3f3   : > { %v1093_v53 = vpop.f32.mrf.mxu0  ;;  %p1880_p5 = pneg %p1879_p3 }
 0x3f4   : > { %v1099_v54 = vmul.f32 %v1718_v52, %v1093_v53 }
 0x3f5   : > { %v1561_v55 = vpop.f32.mrf.mxu0  ;;  %p1887_p4 = pnand %p1886_p13, %p1880_p5 }
 0x3f6   : > { %1109 = vrot.lane.b32.xlu1 %v1099_v54, %s1970_s25  ;;  %s2293_s25 = scalar_lea.hbm %s2346_s11, %s1455_s24 }
 0x3f7   : > { %v1096_v56 = vpop.f32.mrf.mxu0 }
 0x3f9   : > { %v1562_v57 = vpop.f32.mrf.mxu0 }
 0x458   : > { %v1102_v60 = vpop.permute.xlu0 %1101 }
 0x459   : > { %v1112_v63 = vsel %vm661_vm2, %v766_v62, %v1102_v60 }
 0x460   : > { %v1106_v61 = vpop.permute.xlu1 %1105 }
 0x461   : > { %v1114_v1 = vsel %vm1113_vm4, %v1112_v63, %v1106_v61 }
 0x468   : > { %v1110_v2 = vpop.permute.xlu1 %1109 }
 0x469   : > { %v1116_v4 = vsel %vm1115_vm5, %v1114_v1, %v1110_v2 }
 0x46a   : > { %v1117_v5 = vadd.f32 %v1116_v4, %v2184_v3 }
 0x46c   : > { %v1118_v6 = vpack.c.bf16 %v1117_v5, %v1117_v5 }
 0x46e   : > { %1568 = vmatmul.mubr.msk.bf16.vlgmr.msra.gmra.mxu1 %vm488_vm1, %v1118_v6 }
 0x52e   : > { %v1179_v10 = vpop.f32.mrf.mxu1 }
 0x52f   : > { %v1180_v3 = vadd.f32 %v1444_v9, %v1179_v10 }
 0x530   : > { %v1569_v11 = vpop.f32.mrf.mxu1 }
 0x531   : > { %vm1185_vm6 = vcmp.ge.f32.partialorder %v1180_v3, 0.0  ;;  %v1186_v12 = vmul.f32 0.01, %v1180_v3 }
 0x532   : > { %v1182_v13 = vpop.f32.mrf.mxu1 }
 0x533   : > { %v1187_v14 = vsel %vm1185_vm6, %v1180_v3, %v1186_v12 }
 0x534   : > { %v1188_v15 = vpack.c.bf16 %v1187_v14, %v1187_v14  ;;  %v1570_v16 = vpop.f32.mrf.mxu1 }
 0x536   : > { %1580 = vmatmul.mubr.msk.bf16.vlgmr.msra.gmra.mxu0 %vm1228_vm7, %v1188_v15 }
 0x5f6   : > { %v1266_v17 = vpop.f32.mrf.mxu0 }
 0x5f7   : > { %v1267_v18 = vadd.f32 %v1448_v0, %v1266_v17 }
 0x5f8   : > { %v1581_v19 = vpop.f32.mrf.mxu0 }
 0x5f9   : > { %1272 = vst.msk [vmem:[%s457_s30] sm:$0xff] %vm488_vm1, %v1267_v18 }
 0x5fa   : > { %v1269_v20 = vpop.f32.mrf.mxu0 }
 0x5fb   : > { %1890 = shalt.err (!%p1887_p4)
}
 0x5fc   : > { %s1891_s2 = scalar_lea.hbm %s2293_s25, 128  ;;  %s1895_s15 = scalar_lea.hbm %s2346_s11, 256 }
 0x5fd   : > { %p1892_p7 = scmp.ne.s32.totalorder %s2293_s25, %s1891_s2  ;;  %p1896_p11 = scmp.lt.s32.totalorder %s2293_s25, %s2346_s11 }
 0x5fe   : > { %p1897_p0 = scmp.lt.s32.totalorder %s1895_s15, %s1891_s2 }
 0x5ff   : > { %p1893_p8 = pnand %p1892_p7, %p2371_p9 }
 0x600   : > { %p1898_p1 = por %p1897_p0, %p1896_p11 }
 0x601   : > { %p1894_p12 = pneg %p1893_p8 }
 0x603   : > { %p1899_p2 = pnand %p1898_p1, %p1894_p12 }
 0x605   : > { %1902 = shalt.err (!%p1899_p2)
}
 0x606   : > { %1607 = dma.vmem_to_hbm [thread:$0]  (%p2371_p9), %s2295_s12, 128, %s2293_s25, %s1274_s16   ;;  %v1582_v21 = vpop.f32.mrf.mxu0 }
 0x607 PF: > { %p1644_p3 = scmp.ge.s32.totalorder %s1953_s20, 2  ;;  %s1299_s13 = sand.u32 1, %s1941_s17  }
 0x608   : > { %p2372_p5 = scmp.ne.s32.totalorder %s2356_s28, 0  ;;  %s1300_s14 = scalar_lea.sflag [#allocation4], %s1299_s13 }
 0x60a   : > { %p1629_p6 = pnand %p1644_p3, %p2372_p5 }
 0x60c   : > { %p1630_p10 = pneg %p1629_p6 }
 0x60e   : > { %1936 = dma.done.wait (%p1630_p10), %s1300_s14, 128  }
 0x60f   : > { %1938 = vsyncadd (%p1630_p10), %s1300_s14, 4294967168  ;;  %s2373_s21 = sld [smem:[#allocation19_spill]]  ;;  %p25_p13 = scmp.ge.s32.totalorder %s2057_s23, 4  }
 0x610   : > { %s2374_s19 = sld [smem:[#allocation20_spill]]  ;;  %s2375_s17 = smov %s1945_s18 }
 0x611   : > { %s2377_s20 = smov %s2057_s23  ;;  %27 = sbr.rel (!%p25_p13) target bundleno = 10 (0xa), region = 124 }
 0x615   : > { %s2376_s18 = smov %s2373_s21 }
 0x616   :  { %1305 = vsyncpa [#allocation3], 1 }
 0x617   :  { %1307 = vsyncpa [#allocation3 + $0x1], 1 }
 0x618   :  { %1308 = vsyncpa [#allocation6], 1 }
 0x619   :  { %1309 = vsyncpa [#allocation9], 1 }
 0x61a   :  { %1310 = vsyncpa [#allocation12], 1 }
 0x61b   :  { %1311 = vsyncpa [#allocation4], 1 }
 0x61c   :  { %1313 = vsyncpa [#allocation4 + $0x1], 1 }

</bundles_post_ra>
